<compile_context>
chip_gen: v7x
topology: tpu7x:2x2x1
jax: 0.10.0
libtpu: 0.0.40
codegen_flags: <defaults>
</compile_context>

<pallas_src>
import jax
import jax.numpy as jnp
from jax.experimental import pallas as pl
from jax.experimental.pallas import tpu as pltpu


DEFAULT_TILE = 256  # tokens gathered per grid step


def _round_up(x, m):
    return (x + m - 1) // m * m


def _embed_kernel(ids_ref, emb_ref, out_ref):
    # ids_ref : VMEM (TILE, 1)        int32 token ids for this tile
    # emb_ref : VMEM (vocab_p, D)     full (vocab-padded) embedding table, resident
    # out_ref : VMEM (TILE, D)        lane-dense output block
    tile = out_ref.shape[0]
    vocab_p = emb_ref.shape[0]

    ids = ids_ref[...]                                              # (TILE, 1)
    iota = jax.lax.broadcasted_iota(jnp.int32, (tile, vocab_p), 1)  # (TILE, vocab_p)
    onehot = (iota == ids).astype(emb_ref.dtype)                    # (TILE, vocab_p)

    out_ref[...] = jnp.dot(
        onehot, emb_ref[...], preferred_element_type=jnp.float32
    ).astype(out_ref.dtype)


def embedder_forward(x, embed_table, *, tile=DEFAULT_TILE):
    """x: (batch, seq) int; embed_table: (vocab, d_model) -> (batch, seq, d_model)."""
    batch, seq = x.shape
    vocab, d_model = embed_table.shape
    n = batch * seq

    # Big tiles amortize the ~0.35us per-grid-step overhead; shrink for tiny inputs
    # so we don't pad a toy batch up to 256 rows.
    tile = min(tile, _round_up(n, 8))
    n_pad = _round_up(n, tile)

    # Clamp ids (no runtime OOB checks on VMEM refs) and pad token count.
    ids = jnp.clip(x.reshape(n).astype(jnp.int32), 0, vocab - 1)
    ids = jnp.pad(ids, (0, n_pad - n)).reshape(n_pad, 1)

    # Pad vocab (the one-hot contraction dim) to a multiple of 128.
    vocab_p = _round_up(vocab, 128)
    table = embed_table
    if vocab_p != vocab:
        table = jnp.pad(embed_table, ((0, vocab_p - vocab), (0, 0)))

    out = pl.pallas_call(
        _embed_kernel,
        out_shape=jax.ShapeDtypeStruct((n_pad, d_model), embed_table.dtype),
        grid_spec=pltpu.PrefetchScalarGridSpec(
            num_scalar_prefetch=0,
            grid=(n_pad // tile,),
            in_specs=[
                # per-step tile of token ids, sublane-major (TILE, 1)
                pl.BlockSpec((tile, 1), lambda i: (i, 0)),
                # whole (padded) embedding table resident in VMEM every step
                pl.BlockSpec((vocab_p, d_model), lambda i: (0, 0)),
            ],
            out_specs=pl.BlockSpec((tile, d_model), lambda i: (i, 0)),
        ),
        compiler_params=pltpu.CompilerParams(
            dimension_semantics=("parallel",),
            vmem_limit_bytes=64 * 1024 * 1024,
        ),
    )(ids, table)

    return out[:n].reshape(batch, seq, d_model)


if __name__ == "__main__":
    vocab_size = 64
    d_model = 128
    batch, seq = 2, 8

    key = jax.random.PRNGKey(0)
    k_emb, k_ids = jax.random.split(key)

    # nn.Embedding default init: N(0, 1)
    embed_table = jax.random.normal(k_emb, (vocab_size, d_model), dtype=jnp.float32)
    x = jax.random.randint(k_ids, (batch, seq), 0, vocab_size, dtype=jnp.int32)

    out = embedder_forward(x, embed_table)
    out = jax.block_until_ready(out)

    # correctness check against plain JAX gather (== torch nn.Embedding lookup)
    ref = embed_table[x]
    assert out.shape == (batch, seq, d_model)
    assert jnp.allclose(out, ref), "mismatch vs reference gather"

    print("KERNEL_OK")
</pallas_src>

<mosaic_0001>
module attributes {stable_mosaic.version = 11 : i64} {
  func.func @_embed_kernel(%arg0: i32, %arg1: memref<16x1xi32, #tpu.memory_space<vmem>>, %arg2: memref<128x128xf32, #tpu.memory_space<vmem>>, %arg3: memref<16x128xf32, #tpu.memory_space<vmem>>) attributes {dimension_semantics = [#tpu.dimension_semantics<parallel>], iteration_bounds = array<i64: 1>, scalar_prefetch = 0 : i64, scratch_operands = 0 : i64, tpu.core_type = #tpu.core_type<tc>, window_params = [{transform_indices = @transform_0, window_bounds = array<i64: 16, 1>}, {pipeline_mode = #tpu.pipeline_mode<synchronous>, transform_indices = @transform_1, window_bounds = array<i64: 128, 128>}, {transform_indices = @transform_2, window_bounds = array<i64: 16, 128>}]} {
    %c0 = arith.constant 0 : index
    %c0_0 = arith.constant 0 : index
    %0 = vector.load %arg1[%c0, %c0_0] : memref<16x1xi32, #tpu.memory_space<vmem>>, vector<16x1xi32>
    %1 = tpu.iota {dimensions = array<i32: 1>} : vector<16x128xi32>
    %2 = vector.broadcast %0 : vector<16x1xi32> to vector<16x128xi32>
    %3 = arith.cmpi eq, %1, %2 : vector<16x128xi32>
    %4 = arith.extui %3 : vector<16x128xi1> to vector<16x128xi32>
    %5 = arith.sitofp %4 : vector<16x128xi32> to vector<16x128xf32>
    %c0_1 = arith.constant 0 : index
    %c0_2 = arith.constant 0 : index
    %6 = vector.load %arg2[%c0_1, %c0_2] : memref<128x128xf32, #tpu.memory_space<vmem>>, vector<128x128xf32>
    %cst = arith.constant dense<0.000000e+00> : vector<16x128xf32>
    %7 = tpu.matmul %5, %6, %cst {dimension_numbers = #tpu.dot_dimension_numbers<[1], [0], [0], [1], [0, 0, 1, 1], [], []>} : vector<16x128xf32>, vector<128x128xf32>, vector<16x128xf32> -> vector<16x128xf32>
    %c0_3 = arith.constant 0 : index
    %c0_4 = arith.constant 0 : index
    %8 = vector.load %arg3[%c0_3, %c0_4] : memref<16x128xf32, #tpu.memory_space<vmem>>, vector<16x128xf32>
    tpu.vector_store %arg3[%c0_3, %c0_4], %7 {strides = array<i32>} : memref<16x128xf32, #tpu.memory_space<vmem>>, vector<16x128xf32>,
    return
  }
  func.func @transform_0(%arg0: i32) -> (i32, i32) {
    %c0_i32 = arith.constant 0 : i32
    %c0_i32_0 = arith.constant 0 : i32
    return %arg0, %c0_i32 : i32, i32
  }
  func.func @transform_1(%arg0: i32) -> (i32, i32) {
    %c0_i32 = arith.constant 0 : i32
    %c0_i32_0 = arith.constant 0 : i32
    %c0_i32_1 = arith.constant 0 : i32
    return %c0_i32, %c0_i32_0 : i32, i32
  }
  func.func @transform_2(%arg0: i32) -> (i32, i32) {
    %c0_i32 = arith.constant 0 : i32
    %c0_i32_0 = arith.constant 0 : i32
    return %arg0, %c0_i32 : i32, i32
  }
}

</mosaic_0001>

<bundles_post_ra>
// kernel: tpu_custom_call.1
= control target key start
LH: loop header
LB: loop body
LE: loop exit
PB: predicated region body
PF: predicated region fallthrough
CT: control target
= control target key end

     0   :  { %7 = vsyncpa [#allocation3], 0  ;;  %s403_s0 = inlined_call_operand.hbm [shape: s32[16,1], index: 0, kind: input, shape index: {}]   ;;  %s404_s1 = inlined_call_operand.hbm [shape: f32[128,128], index: 1, kind: input, shape index: {}]   ;;  %s405_s2 = inlined_call_operand.hbm [shape: f32[16,128], index: 2, kind: output, shape index: {}]  }
   0x1   :  { %8 = vsyncpa [#allocation6], 0 }
   0x2   :  { %9 = vsyncpa [#allocation4], 0  ;;  %s336_s9 = smov [#allocation2]   ;;  %s264_s13 = scalar_lea.hbm %s403_s0, 256 }
   0x3   :  { %s15_s10 = sshll.u32 %s336_s9, 4  ;;  %p265_p0 = scmp.ne.s32.totalorder %s403_s0, %s264_s13  ;;  %s16_s10 = int_to_ptr.vmem [resolvable:$true] %s15_s10 }
   0x4   :  { %p268_p1 = scmp.lt.u32.totalorder %s264_s13, %s403_s0 }
   0x6   :  { %p270_p2 = pnand %p268_p1, %p265_p0 }
   0x8   :  { %273 = shalt.err (!%p270_p2)
}
   0x9   :  { %s274_s18 = scalar_lea.vmem %s16_s10, 256  ;;  %p279_p4 = scmp.lt.s32.totalorder %s16_s10, %s16_s10 }
   0xa   :  { %p275_p3 = scmp.ne.s32.totalorder %s16_s10, %s274_s18  ;;  %p280_p5 = scmp.lt.s32.totalorder %s274_s18, %s274_s18 }
   0xc   :  { %p281_p6 = por %p280_p5, %p279_p4 }
   0xe   :  { %p282_p7 = pnand %p281_p6, %p275_p3 }
  0x10   :  { %285 = shalt.err (!%p282_p7)
}
  0x11   :  { %s337_s19 = smov 128   ;;  %s338_s20 = smov 8  }
  0x12   :  { %21 = dma.hbm_to_vmem [thread:$0]  %s403_s0, 256, %s16_s10, [#allocation3], %s337_s19, %s337_s19, %s338_s20  }
  0x13   :  { %s339_s23 = smov [#allocation5]   ;;  %s286_s27 = scalar_lea.hbm %s404_s1, 2048 }
  0x14   :  { %s27_s24 = sshll.u32 %s339_s23, 4  ;;  %p287_p8 = scmp.ne.s32.totalorder %s404_s1, %s286_s27  ;;  %s28_s24 = int_to_ptr.vmem [resolvable:$true] %s27_s24 }
  0x15   :  { %p290_p9 = scmp.lt.u32.totalorder %s286_s27, %s404_s1 }
  0x17   :  { %p292_p10 = pnand %p290_p9, %p287_p8 }
  0x19   :  { %295 = shalt.err (!%p292_p10)
}
  0x1a   :  { %s296_s4 = scalar_lea.vmem %s28_s24, 2048  ;;  %p301_p12 = scmp.lt.s32.totalorder %s28_s24, %s28_s24 }
  0x1b   :  { %p297_p11 = scmp.ne.s32.totalorder %s28_s24, %s296_s4  ;;  %p302_p13 = scmp.lt.s32.totalorder %s296_s4, %s296_s4 }
  0x1d   :  { %p303_p0 = por %p302_p13, %p301_p12 }
  0x1f   :  { %p304_p1 = pnand %p303_p0, %p297_p11 }
  0x21   :  { %307 = shalt.err (!%p304_p1)
}
  0x22   :  { %33 = dma.hbm_to_vmem [thread:$0]  %s404_s1, 2048, %s28_s24, [#allocation6], %s337_s19, %s337_s19, %s338_s20  }
  0x23   :  { %330 = dma.done.wait [#allocation3], 256  }
  0x24   :  { %331 = vsyncadd [#allocation3], 4294967040 }
  0x25   :  { %332 = dma.done.wait [#allocation6], 2048  }
  0x26   :  { %333 = vsyncadd [#allocation6], 4294965248  ;;  %v340_v0 = vmov 0   ;;  %v40_v1 = vld [vmem:[#allocation2] sm:$0xff]  ;;  %v56_v2 = vld [vmem:[#allocation5] sm:$0xff]  ;;  %v42_v27 = vlaneseq  ;;  %v341_v30 = vmov 1.0  }
  0x27   :  { %263 = vset.pattern.permute.xlu0 %v340_v0  ;;  %v57_v3 = vld [vmem:[#allocation5 + $0x8] sm:$0xff]  ;;  %v58_v4 = vld [vmem:[#allocation5 + $0x10] sm:$0xff]  ;;  %v59_v5 = vld [vmem:[#allocation5 + $0x18] sm:$0xff]  ;;  %s342_s1 = smov [#allocation7]  }
  0x28   :  { %45 = vperm.xlu0 %263, %v40_v1   ;;  %v41_v6 = vld [vmem:[#allocation2 + $0x8] sm:$0xff]  ;;  %v224_v7 = vpack.c.bf16 %v57_v3, %v56_v2  ;;  %v228_v8 = vpack.c.bf16 %v59_v5, %v58_v4  ;;  %v60_v9 = vld [vmem:[#allocation5 + $0x20] sm:$0xff]  ;;  %v61_v10 = vld [vmem:[#allocation5 + $0x28] sm:$0xff]  ;;  %v43_v28 = vand.u32 127, %v42_v27  ;;  %s154_s6 = sshll.u32 %s342_s1, 4  ;;  %s155_s6 = int_to_ptr.vmem [resolvable:$true] %s154_s6 }
  0x29   :  { %v232_v11 = vpack.c.bf16 %v61_v10, %v60_v9  ;;  %v62_v12 = vld [vmem:[#allocation5 + $0x30] sm:$0xff]  ;;  %v63_v13 = vld [vmem:[#allocation5 + $0x38] sm:$0xff]  ;;  %v64_v15 = vld [vmem:[#allocation5 + $0x40] sm:$0xff]  ;;  %s308_s7 = scalar_lea.vmem %s155_s6, 256  ;;  %p313_p3 = scmp.lt.s32.totalorder %s155_s6, %s155_s6 }
  0x2a   :  { %225 = vmatprep.subr.bf16.mxu0 %v224_v7  ;;  %v236_v14 = vpack.c.bf16 %v63_v13, %v62_v12  ;;  %v65_v16 = vld [vmem:[#allocation5 + $0x48] sm:$0xff]  ;;  %v66_v18 = vld [vmem:[#allocation5 + $0x50] sm:$0xff]  ;;  %v67_v19 = vld [vmem:[#allocation5 + $0x58] sm:$0xff]  ;;  %p309_p2 = scmp.ne.s32.totalorder %s155_s6, %s308_s7  ;;  %p314_p4 = scmp.lt.s32.totalorder %s308_s7, %s308_s7 }
  0x2b   :  { %227 = vmatpush3.bf16.msra.mxu0 %v224_v7  ;;  %v240_v17 = vpack.c.bf16 %v65_v16, %v64_v15  ;;  %v244_v20 = vpack.c.bf16 %v67_v19, %v66_v18  ;;  %v68_v21 = vld [vmem:[#allocation5 + $0x60] sm:$0xff]  ;;  %v69_v22 = vld [vmem:[#allocation5 + $0x68] sm:$0xff]  ;;  %v70_v24 = vld [vmem:[#allocation5 + $0x70] sm:$0xff] }
  0x2c   :  { %48 = vperm.xlu0 %263, %v41_v6   ;;  %229 = vmatprep.subr.bf16.mxu0 %v228_v8  ;;  %v248_v23 = vpack.c.bf16 %v69_v22, %v68_v21  ;;  %v71_v25 = vld [vmem:[#allocation5 + $0x78] sm:$0xff]  ;;  %p315_p5 = por %p314_p4, %p313_p3 }
  0x2d   :  { %v252_v26 = vpack.c.bf16 %v71_v25, %v70_v24 }
  0x2e   :  { %p316_p6 = pnand %p315_p5, %p309_p2 }
  0x2f   :  { %231 = vmatpush3.bf16.msra.mxu0 %v228_v8 }
  0x30   :  { %233 = vmatprep.subr.bf16.mxu0 %v232_v11 }
  0x33   :  { %235 = vmatpush3.bf16.msra.mxu0 %v232_v11 }
  0x34   :  { %237 = vmatprep.subr.bf16.mxu0 %v236_v14 }
  0x37   :  { %239 = vmatpush3.bf16.msra.mxu0 %v236_v14 }
  0x38   :  { %241 = vmatprep.subr.bf16.mxu0 %v240_v17 }
  0x3b   :  { %243 = vmatpush3.bf16.msra.mxu0 %v240_v17 }
  0x3c   :  { %245 = vmatprep.subr.bf16.mxu0 %v244_v20 }
  0x3f   :  { %247 = vmatpush3.bf16.msra.mxu0 %v244_v20 }
  0x40   :  { %249 = vmatprep.subr.bf16.mxu0 %v248_v23 }
  0x43   :  { %251 = vmatpush3.bf16.msra.mxu0 %v248_v23 }
  0x44   :  { %253 = vmatprep.subr.bf16.mxu0 %v252_v26 }
  0x47   :  { %255 = vmatpush3.bf16.msra.mxu0 %v252_v26 }
  0xa7   :  { %v46_v29 = vpop.permute.xlu0 %45 }
  0xa8   :  { %vm50_vm0 = vcmp.eq.s32.totalorder %v43_v28, %v46_v29 }
  0xa9   :  { %221 = vmatprep.mubr.msk.f32.mxu0 %vm50_vm0, %v341_v30 }
  0xab   :  { %v49_v31 = vpop.permute.xlu0 %48 }
  0xac   :  { %vm51_vm1 = vcmp.eq.s32.totalorder %v43_v28, %v49_v31 }
  0xad   :  { %222 = vmatmul.mubr.msk.f32.vlgmr.msra.gmra.mrb[0].mxu0 %vm51_vm1, %v341_v30 }
 0x180   :  { %v223_v32 = vpop.f32.mrb[0].mxu0 }
 0x181   :  { %148 = vst [vmem:[#allocation7 + $0x8] sm:$0xff] %v223_v32  ;;  %v138_v33 = vpop.f32.mrb[1].mxu0 }
 0x182   :  { %147 = vst [vmem:[#allocation7] sm:$0xff] %v138_v33 }
 0x183   :  { %319 = shalt.err (!%p316_p6)
}
 0x184   :  { %s320_s10 = scalar_lea.hbm %s405_s2, 256 }
 0x185   :  { %p321_p7 = scmp.ne.s32.totalorder %s405_s2, %s320_s10  ;;  %p324_p8 = scmp.lt.u32.totalorder %s320_s10, %s405_s2 }
 0x187   :  { %p326_p9 = pnand %p324_p8, %p321_p7 }
 0x189   :  { %329 = shalt.err (!%p326_p9)
}
 0x18a   :  { %160 = dma.vmem_to_hbm [thread:$0]  %s155_s6, 256, %s405_s2, [#allocation4], %s337_s19, %s337_s19, %s338_s20  }
 0x18b   :  { %334 = dma.done.wait [#allocation4], 256  }
 0x18c   :  { %335 = vsyncadd [#allocation4], 4294967040 }
 0x18d   :  { %164 = vsyncpa [#allocation3], 1 }
 0x18e   :  { %165 = vsyncpa [#allocation6], 1 }
 0x18f   :  { %166 = vsyncpa [#allocation4], 1 }

</bundles_post_ra>
